<compile_context>
chip_gen: v6e
topology: v6e:2x2x1
jax: 0.10.0
libtpu: 0.0.40
codegen_flags: <defaults>
</compile_context>

<pallas_src>
import math

import jax
import jax.numpy as jnp
from jax import lax
from jax.experimental import pallas as pl
from jax.experimental.pallas import tpu as pltpu

TAU = 0.5
EPS = 1e-10
# g_hat = sqrt(2*onehot^2 + 1e-6) / max(...) collapses to two constants
# because onehot is exactly 0/1 and a 1 always exists (ignore labels -> 0).
GHAT_HI = 1.0
GHAT_LO = math.sqrt(1e-6) / math.sqrt(2.0 + 1e-6)   # ~7.07e-4 (>> 1e-8 thresh)


def _round_up(x, m):
    return (x + m - 1) // m * m


def _make_pass1_kernel(s_total, ts, ignore_pixel):
    """Per (n, t): gumbel-softmax over channels, write sign-packed bf16
    unnormalized magnitude and the per-tile max of the softmax sample."""
    def kernel(logits_ref, u_ref, labels_ref, gpack_ref, max_ref):
        t = pl.program_id(1)
        C = logits_ref.shape[1]

        # loop-invariant lane bookkeeping (computed once per grid step)
        lane = lax.broadcasted_iota(jnp.int32, (1, ts), 1)
        valid = (t * ts + lane) < s_total                      # (1, ts)

        lab = labels_ref[0]                                    # (1, ts)
        kill = jnp.logical_or(lab == ignore_pixel, jnp.logical_not(valid))
        x = jnp.where(kill, 0.0, logits_ref[0])                # (C, ts)
        lab = jnp.where(kill, 0, lab)

        gumbel = -jnp.log(EPS - jnp.log(u_ref[0] + EPS))       # (C, ts)
        y = (x + gumbel) * (1.0 / TAU)
        y = y - jnp.max(y, axis=0, keepdims=True)
        e = jnp.exp(y)
        # TODO(synk): pl.reciprocal(approx=True) is the cheaper EUP path on
        # hardware, but the interpret fallback used in CI may not lower it,
        # so a plain divide is used here.
        soft = e / jnp.sum(e, axis=0, keepdims=True)           # (C, ts)

        g_un = jnp.sqrt(2.0 * soft * soft + 1e-6)              # (C, ts)
        c_iota = lax.broadcasted_iota(jnp.int32, (C, ts), 0)
        # sign-pack the one-hot channel so pass 2 needs neither labels nor
        # logits: negative == "g_hat = GHAT_HI", positive == "g_hat = GHAT_LO"
        g_signed = jnp.where(lab == c_iota, -g_un, g_un)
        gpack_ref[0] = g_signed.astype(gpack_ref.dtype)

        m = jnp.max(jnp.where(valid, soft, 0.0))               # soft >= 0
        max_ref[...] = jnp.full(max_ref.shape, m, jnp.float32)
    return kernel


def _make_pass2_kernel(s_total, ts):
    """Per (n, t): read sign-packed magnitude, normalize by the global max
    (passed as an SMEM scalar), accumulate sum |g - g_hat| over valid lanes."""
    def kernel(inv_ref, gpack_ref, out_ref):
        t = pl.program_id(1)
        lane = lax.broadcasted_iota(jnp.int32, (1, ts), 1)
        valid = (t * ts + lane) < s_total                      # (1, ts)

        gs = gpack_ref[0].astype(jnp.float32)                  # (C, ts)
        g = jnp.abs(gs) * inv_ref[0]
        g_hat = jnp.where(gs < 0.0, GHAT_HI, GHAT_LO)
        diff = jnp.where(valid, jnp.abs(g - g_hat), 0.0)
        out_ref[...] = jnp.full(out_ref.shape, jnp.sum(diff), jnp.float32)
    return kernel


def dual_task_loss(input_logits, gts, gumbel_u, num_classes,
                   ignore_pixel=255, tile_s=16384):
    """input_logits: (N, C, D, H, W) f32; gts: (N, D, H, W) int labels;
    gumbel_u: (N, C, D*H*W) U[0,1) noise (stands in for torch.rand)."""
    N, C, D, H, W = input_logits.shape
    assert C == num_classes
    S = D * H * W

    ts = max(128, min(_round_up(int(tile_s), 128), _round_up(S, 128)))
    T = pl.cdiv(S, ts)
    S_pad = T * ts

    logits2 = input_logits.reshape(N, C, S).astype(jnp.float32)
    labels = gts.reshape(N, 1, S).astype(jnp.int32)
    u = gumbel_u.reshape(N, C, S).astype(jnp.float32)
    if S_pad != S:
        # padded tail lanes are excluded in-kernel via the valid-lane mask
        pad3 = ((0, 0), (0, 0), (0, S_pad - S))
        logits2 = jnp.pad(logits2, pad3)
        u = jnp.pad(u, pad3)
        labels = jnp.pad(labels, pad3)

    # VMEM budget from the actual (1, C, ts) block sizes: double-buffered
    # inputs/outputs + generous room for live f32 temporaries.  No 32 MiB
    # floor; capped at 48 MiB so it also fits v7x's 64 MiB physical VMEM.
    blk_in = 2 * C * ts * 4 + ts * 4            # logits + uniforms + labels
    blk_out = C * ts * 2 + 8 * 128 * 4          # bf16 intermediate + max blk
    need = 2 * (blk_in + blk_out) + 16 * C * ts * 4 + (4 << 20)
    vmem_limit = int(min(max(need, 12 << 20), 48 << 20))
    cparams = pltpu.CompilerParams(
        dimension_semantics=("parallel", "parallel"),
        vmem_limit_bytes=vmem_limit)

    # ---- pass 1: sign-packed unnormalized magnitude + per-tile max(soft) ----
    gpack, max_blocks = pl.pallas_call(
        _make_pass1_kernel(S, ts, ignore_pixel),
        out_shape=(
            jax.ShapeDtypeStruct((N, C, S_pad), jnp.bfloat16),
            jax.ShapeDtypeStruct((N, T * 8, 128), jnp.float32),
        ),
        grid=(N, T),
        in_specs=[
            pl.BlockSpec((1, C, ts), lambda n, t: (n, 0, t)),
            pl.BlockSpec((1, C, ts), lambda n, t: (n, 0, t)),
            pl.BlockSpec((1, 1, ts), lambda n, t: (n, 0, t)),
        ],
        out_specs=(
            pl.BlockSpec((1, C, ts), lambda n, t: (n, 0, t)),
            pl.BlockSpec((1, 8, 128), lambda n, t: (n, t, 0)),
        ),
        compiler_params=cparams,
    )(logits2, u, labels)

    # max(g) = sqrt(2*max(soft)^2 + 1e-6) (monotone), so normalization is a
    # single scalar, handed to pass 2 through SMEM.
    m_soft = jnp.max(max_blocks)
    inv_mag = (1.0 / jnp.sqrt(2.0 * m_soft * m_soft + 1e-6)).reshape(1)
    inv_mag = inv_mag.astype(jnp.float32)

    # ---- pass 2: sum of |g - g_hat| over valid lanes -------------------------
    partial = pl.pallas_call(
        _make_pass2_kernel(S, ts),
        out_shape=jax.ShapeDtypeStruct((N, T * 8, 128), jnp.float32),
        grid=(N, T),
        in_specs=[
            pl.BlockSpec(memory_space=pltpu.MemorySpace.SMEM),
            pl.BlockSpec((1, C, ts), lambda n, t: (n, 0, t)),
        ],
        out_specs=pl.BlockSpec((1, 8, 128), lambda n, t: (n, t, 0)),
        compiler_params=cparams,
    )(inv_mag, gpack)

    total = jnp.sum(partial.reshape(N, T, 8, 128)[:, :, 0, 0])
    # 0.5*loss_g + 0.5*loss_g_hat with all-ones >=1e-8 masks == mean|g - g_hat|
    return total / (jnp.float32(N * C * S) + EPS)


def _reference(input_logits, gts, u, num_classes, ignore_pixel=255):
    """Pure-JAX port of the PyTorch module (keeps the masks and the 0.5+0.5
    combination that the kernels simplify away)."""
    N, C, D, H, W = input_logits.shape
    S = D * H * W
    logits = input_logits.reshape(N, C, S).astype(jnp.float32)
    labels = gts.reshape(N, S).astype(jnp.int32)
    ignore = labels == ignore_pixel
    logits = jnp.where(ignore[:, None, :], 0.0, logits)
    labels = jnp.where(ignore, 0, labels)
    onehot = jax.nn.one_hot(labels, num_classes, axis=1, dtype=jnp.float32)
    gumbel = -jnp.log(EPS - jnp.log(u.reshape(N, C, S).astype(jnp.float32) + EPS))
    soft = jax.nn.softmax((logits + gumbel) / TAU, axis=1)
    g = jnp.sqrt(soft * soft + soft * soft + 1e-6)
    g = g / jnp.max(g)
    gh = jnp.sqrt(onehot * onehot + onehot * onehot + 1e-6)
    gh = gh / jnp.max(gh)
    le = jnp.abs(g - gh)
    m1 = (g >= 1e-8).astype(jnp.float32)
    m2 = (gh >= 1e-8).astype(jnp.float32)
    return (0.5 * jnp.sum(le * m1) / (jnp.sum(m1) + EPS)
            + 0.5 * jnp.sum(le * m2) / (jnp.sum(m2) + EPS))


if __name__ == "__main__":
    num_classes = 4
    N, C, D, H, W = 2, num_classes, 2, 8, 24     # S = 384
    TILE_S = 256                                 # -> 2 tiles, 128 padded lanes

    key = jax.random.PRNGKey(0)
    k_logits, k_labels, k_u = jax.random.split(key, 3)
    input_logits = jax.random.normal(k_logits, (N, C, D, H, W),
                                     dtype=jnp.float32)
    gts = jax.random.randint(k_labels, (N, D, H, W), 0, num_classes,
                             dtype=jnp.int32)
    # sprinkle some ignore pixels (255)
    gts = gts.at[0, 0, :2, :3].set(255)
    gts = gts.at[1, 1, 4:6, 10:12].set(255)

    # TODO(synk): the PyTorch module samples its uniforms with torch.rand on
    # the CUDA stream; that exact stream is not reproducible here, so the
    # Gumbel uniforms come from jax.random and are shared with the reference.
    u = jax.random.uniform(k_u, (N, C, D * H * W), dtype=jnp.float32)

    loss = dual_task_loss(input_logits, gts, u, num_classes, tile_s=TILE_S)
    loss = jax.block_until_ready(loss)

    ref = _reference(input_logits, gts, u, num_classes)
    assert bool(jnp.isfinite(loss)), float(loss)
    # tolerance covers the bf16 rounding of the pass-1 intermediate (~0.2%)
    assert jnp.allclose(loss, ref, rtol=1e-2, atol=1e-4), (float(loss),
                                                           float(ref))
    print("KERNEL_OK")
</pallas_src>

<mosaic_0001>
module attributes {stable_mosaic.version = 11 : i64} {
  func.func @kernel(%arg0: i32, %arg1: i32, %arg2: memref<1x4x256xf32, #tpu.memory_space<vmem>>, %arg3: memref<1x4x256xf32, #tpu.memory_space<vmem>>, %arg4: memref<1x1x256xi32, #tpu.memory_space<vmem>>, %arg5: memref<1x4x256xbf16, #tpu.memory_space<vmem>>, %arg6: memref<1x8x128xf32, #tpu.memory_space<vmem>>) attributes {dimension_semantics = [#tpu.dimension_semantics<parallel>, #tpu.dimension_semantics<parallel>], iteration_bounds = array<i64: 2, 2>, scalar_prefetch = 0 : i64, scratch_operands = 0 : i64, tpu.core_type = #tpu.core_type<tc>, window_params = [{transform_indices = @transform_0, window_bounds = array<i64: 1, 4, 256>}, {transform_indices = @transform_1, window_bounds = array<i64: 1, 4, 256>}, {transform_indices = @transform_2, window_bounds = array<i64: 1, 1, 256>}, {transform_indices = @transform_3, window_bounds = array<i64: 1, 4, 256>}, {transform_indices = @transform_4, window_bounds = array<i64: 1, 8, 128>}]} {
    %0 = tpu.iota {dimensions = array<i32: 1>} : vector<1x256xi32>
    %c256_i32 = arith.constant 256 : i32
    %1 = arith.muli %arg1, %c256_i32 : i32
    %2 = vector.broadcast %1 : i32 to vector<1x256xi32>
    %3 = arith.addi %2, %0 : vector<1x256xi32>
    %c384_i32 = arith.constant 384 : i32
    %4 = vector.broadcast %c384_i32 : i32 to vector<1x256xi32>
    %5 = arith.cmpi slt, %3, %4 : vector<1x256xi32>
    %c0 = arith.constant 0 : index
    %c0_0 = arith.constant 0 : index
    %c0_1 = arith.constant 0 : index
    %6 = vector.load %arg4[%c0, %c0_0, %c0_1] : memref<1x1x256xi32, #tpu.memory_space<vmem>>, vector<1x1x256xi32>
    %7 = vector.shape_cast %6 : vector<1x1x256xi32> to vector<1x256xi32>
    %c255_i32 = arith.constant 255 : i32
    %8 = vector.broadcast %c255_i32 : i32 to vector<1x256xi32>
    %9 = arith.cmpi eq, %7, %8 : vector<1x256xi32>
    %cst = arith.constant dense<true> : vector<1x256xi1>
    %10 = arith.xori %5, %cst : vector<1x256xi1>
    %11 = arith.ori %9, %10 : vector<1x256xi1>
    %c0_2 = arith.constant 0 : index
    %c0_3 = arith.constant 0 : index
    %c0_4 = arith.constant 0 : index
    %12 = vector.load %arg2[%c0_2, %c0_3, %c0_4] : memref<1x4x256xf32, #tpu.memory_space<vmem>>, vector<1x4x256xf32>
    %13 = vector.shape_cast %12 : vector<1x4x256xf32> to vector<4x256xf32>
    %cst_5 = arith.constant 0.000000e+00 : f32
    %14 = vector.shape_cast %11 : vector<1x256xi1> to vector<1x256xi1>
    %15 = vector.broadcast %14 : vector<1x256xi1> to vector<4x256xi1>
    %16 = vector.broadcast %cst_5 : f32 to vector<4x256xf32>
    %17 = arith.select %15, %16, %13 : vector<4x256xi1>, vector<4x256xf32>
    %c0_i32 = arith.constant 0 : i32
    %18 = vector.broadcast %c0_i32 : i32 to vector<1x256xi32>
    %19 = arith.select %11, %18, %7 : vector<1x256xi1>, vector<1x256xi32>
    %c0_6 = arith.constant 0 : index
    %c0_7 = arith.constant 0 : index
    %c0_8 = arith.constant 0 : index
    %20 = vector.load %arg3[%c0_6, %c0_7, %c0_8] : memref<1x4x256xf32, #tpu.memory_space<vmem>>, vector<1x4x256xf32>
    %21 = vector.shape_cast %20 : vector<1x4x256xf32> to vector<4x256xf32>
    %cst_9 = arith.constant 1.000000e-10 : f32
    %22 = vector.broadcast %cst_9 : f32 to vector<4x256xf32>
    %23 = arith.addf %21, %22 : vector<4x256xf32>
    %24 = math.log %23 : vector<4x256xf32>
    %cst_10 = arith.constant 1.000000e-10 : f32
    %25 = vector.broadcast %cst_10 : f32 to vector<4x256xf32>
    %26 = arith.subf %25, %24 : vector<4x256xf32>
    %27 = math.log %26 : vector<4x256xf32>
    %cst_11 = arith.constant 0.000000e+00 : f32
    %28 = vector.broadcast %cst_11 : f32 to vector<4x256xf32>
    %29 = arith.subf %28, %27 : vector<4x256xf32>
    %30 = arith.addf %17, %29 : vector<4x256xf32>
    %cst_12 = arith.constant 2.000000e+00 : f32
    %31 = vector.broadcast %cst_12 : f32 to vector<4x256xf32>
    %32 = arith.mulf %30, %31 : vector<4x256xf32>
    %cst_13 = arith.constant dense<0xFF800000> : vector<256xf32>
    %33 = vector.multi_reduction <maximumf>, %32, %cst_13 [0] : vector<4x256xf32> to vector<256xf32>
    %34 = vector.shape_cast %33 : vector<256xf32> to vector<1x256xf32>
    %35 = vector.broadcast %34 : vector<1x256xf32> to vector<4x256xf32>
    %36 = arith.subf %32, %35 : vector<4x256xf32>
    %37 = math.exp %36 : vector<4x256xf32>
    %cst_14 = arith.constant dense<0.000000e+00> : vector<256xf32>
    %38 = vector.multi_reduction <add>, %37, %cst_14 [0] : vector<4x256xf32> to vector<256xf32>
    %39 = vector.shape_cast %38 : vector<256xf32> to vector<1x256xf32>
    %40 = vector.broadcast %39 : vector<1x256xf32> to vector<4x256xf32>
    %41 = arith.divf %37, %40 : vector<4x256xf32>
    %cst_15 = arith.constant 2.000000e+00 : f32
    %42 = vector.broadcast %cst_15 : f32 to vector<4x256xf32>
    %43 = arith.mulf %42, %41 : vector<4x256xf32>
    %44 = arith.mulf %43, %41 : vector<4x256xf32>
    %cst_16 = arith.constant 9.99999997E-7 : f32
    %45 = vector.broadcast %cst_16 : f32 to vector<4x256xf32>
    %46 = arith.addf %44, %45 : vector<4x256xf32>
    %47 = math.sqrt %46 : vector<4x256xf32>
    %48 = tpu.iota {dimensions = array<i32: 0>} : vector<4x256xi32>
    %49 = vector.broadcast %19 : vector<1x256xi32> to vector<4x256xi32>
    %50 = arith.cmpi eq, %49, %48 : vector<4x256xi32>
    %cst_17 = arith.constant 0.000000e+00 : f32
    %51 = vector.broadcast %cst_17 : f32 to vector<4x256xf32>
    %52 = arith.subf %51, %47 : vector<4x256xf32>
    %53 = arith.select %50, %52, %47 : vector<4x256xi1>, vector<4x256xf32>
    %54 = arith.truncf %53 : vector<4x256xf32> to vector<4x256xbf16>
    %c0_18 = arith.constant 0 : index
    %c0_19 = arith.constant 0 : index
    %c0_20 = arith.constant 0 : index
    %55 = vector.load %arg5[%c0_18, %c0_19, %c0_20] : memref<1x4x256xbf16, #tpu.memory_space<vmem>>, vector<1x4x256xbf16>
    %56 = vector.shape_cast %55 : vector<1x4x256xbf16> to vector<4x256xbf16>
    %57 = vector.shape_cast %54 : vector<4x256xbf16> to vector<1x4x256xbf16>
    tpu.vector_store %arg5[%c0_18, %c0_19, %c0_20], %57 {strides = array<i32>} : memref<1x4x256xbf16, #tpu.memory_space<vmem>>, vector<1x4x256xbf16>,
    %cst_21 = arith.constant 0.000000e+00 : f32
    %58 = vector.shape_cast %5 : vector<1x256xi1> to vector<1x256xi1>
    %59 = vector.broadcast %58 : vector<1x256xi1> to vector<4x256xi1>
    %60 = vector.broadcast %cst_21 : f32 to vector<4x256xf32>
    %61 = arith.select %59, %41, %60 : vector<4x256xi1>, vector<4x256xf32>
    %62 = vector.shape_cast %61 : vector<4x256xf32> to vector<1x4x256xf32>
    %cst_22 = arith.constant dense<0xFF800000> : vector<1xf32>
    %63 = vector.multi_reduction <maximumf>, %62, %cst_22 [1, 2] : vector<1x4x256xf32> to vector<1xf32>
    %64 = vector.shape_cast %63 : vector<1xf32> to vector<1x1x1xf32>
    %65 = vector.extract %64[0, 0, 0] : f32 from vector<1x1x1xf32>
    %66 = vector.broadcast %65 : f32 to vector<1x8x128xf32>
    %c0_23 = arith.constant 0 : index
    %c0_24 = arith.constant 0 : index
    %c0_25 = arith.constant 0 : index
    %67 = vector.load %arg6[%c0_23, %c0_24, %c0_25] : memref<1x8x128xf32, #tpu.memory_space<vmem>>, vector<1x8x128xf32>
    tpu.vector_store %arg6[%c0_23, %c0_24, %c0_25], %66 {strides = array<i32>} : memref<1x8x128xf32, #tpu.memory_space<vmem>>, vector<1x8x128xf32>,
    return
  }
  func.func @transform_0(%arg0: i32, %arg1: i32) -> (i32, i32, i32) {
    %c0_i32 = arith.constant 0 : i32
    %c0_i32_0 = arith.constant 0 : i32
    return %arg0, %c0_i32, %arg1 : i32, i32, i32
  }
  func.func @transform_1(%arg0: i32, %arg1: i32) -> (i32, i32, i32) {
    %c0_i32 = arith.constant 0 : i32
    %c0_i32_0 = arith.constant 0 : i32
    return %arg0, %c0_i32, %arg1 : i32, i32, i32
  }
  func.func @transform_2(%arg0: i32, %arg1: i32) -> (i32, i32, i32) {
    %c0_i32 = arith.constant 0 : i32
    %c0_i32_0 = arith.constant 0 : i32
    return %arg0, %c0_i32, %arg1 : i32, i32, i32
  }
  func.func @transform_3(%arg0: i32, %arg1: i32) -> (i32, i32, i32) {
    %c0_i32 = arith.constant 0 : i32
    %c0_i32_0 = arith.constant 0 : i32
    return %arg0, %c0_i32, %arg1 : i32, i32, i32
  }
  func.func @transform_4(%arg0: i32, %arg1: i32) -> (i32, i32, i32) {
    %c0_i32 = arith.constant 0 : i32
    %c0_i32_0 = arith.constant 0 : i32
    return %arg0, %arg1, %c0_i32 : i32, i32, i32
  }
}

</mosaic_0001>

<bundles_post_ra>
// kernel: tpu_custom_call.1
= control target key start
LH: loop header
LB: loop body
LE: loop exit
PB: predicated region body
PF: predicated region fallthrough
CT: control target
= control target key end

     0   :  { %s1382_s0 = inlined_call_operand.hbm [shape: f32[2,4,512], index: 0, kind: input, shape index: {}]   ;;  %s1383_s1 = inlined_call_operand.hbm [shape: f32[2,4,512], index: 1, kind: input, shape index: {}]   ;;  %s1384_s2 = inlined_call_operand.hbm [shape: s32[2,1,512], index: 2, kind: input, shape index: {}]   ;;  %s1385_s3 = inlined_call_operand.hbm [shape: bf16[2,4,512], index: 3, kind: output, shape index: {0}]   ;;  %s1386_s4 = inlined_call_operand.hbm [shape: f32[2,16,128], index: 4, kind: output, shape index: {1}]  }
   0x1   :  { %1392 = sst [smem:[#allocation21_spill]] %s1383_s1 }
   0x2   :  { %10 = vsyncpa [#allocation3], 0 }
   0x3   :  { %12 = vsyncpa [#allocation3 + $0x1], 0 }
   0x4   :  { %13 = vsyncpa [#allocation6], 0 }
   0x5   :  { %15 = vsyncpa [#allocation6 + $0x1], 0 }
   0x6   :  { %16 = vsyncpa [#allocation4], 0 }
   0x7   :  { %18 = vsyncpa [#allocation4 + $0x1], 0 }
   0x8   :  { %19 = vsyncpa [#allocation10], 0 }
   0x9   :  { %21 = vsyncpa [#allocation10 + $0x1], 0  ;;  %s1109_s15 = smov 0   ;;  %s1111_s16 = smov 0  }
   0xa   :  { %s1113_s17 = smov 0   ;;  %s1115_s18 = smov 0  }
   0xb   :  { %s1117_s19 = smov 0   ;;  %s1119_s20 = smov 0  }
   0xc   :  { %s1121_s21 = smov 0   ;;  %s1123_s22 = smov 0  }
   0xd LB: > { %1393 = sst [smem:[#allocation15_spill]] %s1054_s17  ;;  %s1150_s23 = sadd.s32 4294967295, %s1074_s22   ;;  %s1074_s22 = sphi %s1123_s22, %s27_s22   ;;  %s1070_s21 = sphi %s1121_s21, %s1411_s21   ;;  %s1066_s20 = sphi %s1119_s20, %s1410_s20   ;;  %s1062_s19 = sphi %s1117_s19, %s1409_s19   ;;  %s1058_s18 = sphi %s1115_s18, %s1408_s18   ;;  %s1054_s17 = sphi %s1113_s17, %s1407_s17   ;;  %s1050_s16 = sphi %s1111_s16, %s1413_s16   ;;  %s1046_s15 = sphi %s1109_s15, %s1412_s15  }
   0xe   : > { %1394 = sst [smem:[#allocation16_spill]] %s1066_s20  ;;  %s712_s24 = sadd.s32 4294967294, %s1074_s22  }
   0xf   : > { %1395 = sst [smem:[#allocation17_spill]] %s1070_s21  ;;  %s36_s25 = sadd.s32 1, %s1066_s20 }
  0x10   : > { %s39_s26 = sadd.s32 1, %s1070_s21  ;;  %p37_p0 = scmp.ge.s32.totalorder %s36_s25, 2 }
  0x11   : > { %s48_s27 = sadd.s32 1, %s1054_s17  ;;  %p55_p1 = scmp.ne.s32.totalorder %s1054_s17, %s1050_s16 }
  0x12   : > { %p56_p2 = scmp.eq.s32.totalorder %s1074_s22, 0  ;;  %s1415_s25 = smov (%p37_p0, %s36_s25), 0 }
  0x13   : > { %1396 = sst [smem:[#allocation18_spill]] %s1415_s25  ;;  %s1417_s26 = smov (!%p37_p0, %s39_s26), %s1070_s21 }
  0x14   : > { %s44_s28 = ssub.s32 %s1066_s20, %s1415_s25  ;;  %p1164_p3 = por %p56_p2, %p55_p1 }
  0x15   : > { %p41_p4 = scmp.ge.s32.totalorder %s1417_s26, 2  ;;  %p61_p5 = scmp.ne.s32.totalorder %s1050_s16, %s1046_s15 }
  0x16   : > { %p62_p6 = scmp.eq.s32.totalorder %s1150_s23, 0  ;;  %p143_p7 = scmp.eq.s32.totalorder %s1150_s23, 3 }
  0x17   : > { %s1419_s26 = smov (%p41_p4, %s1417_s26), 0  ;;  %p149_p10 = scmp.eq.s32.totalorder %s712_s24, 3 }
  0x18   : > { %1398 = sst [smem:[#allocation19_spill]] %s1419_s26  ;;  %p1174_p8 = por %p62_p6, %p61_p5 }
  0x19   : > { %p1178_p9 = por %p143_p7, %p55_p1  ;;  %s43_s6 = ssub.s32 %s1070_s21, %s1419_s26 }
  0x1a   : > { %s45_s7 = sor.u32 %s44_s28, %s43_s6  ;;  %p1184_p12 = por %p149_p10, %p61_p5 }
  0x1b   : > { %p46_p11 = scmp.eq.s32.totalorder %s45_s7, 0  ;;  %p774_p13 = scmp.lt.s32.totalorder %s1074_s22, 4 }
  0x1c   : > { %s1190_s9 = sand.u32 1, %s1054_s17   ;;  %s716_s12 = sshll.u32 %s1066_s20, 1 }
  0x1d   : > { %s1193_s10 = scalar_select %p46_p11, %s1054_s17, %s48_s27  }
  0x1e   : > { %s715_s11 = sshll.u32 %s1190_s9, 3  ;;  %s717_s13 = sshll.u32 %s1070_s21, 2 }
  0x1f   : > { %1402 = sst [smem:[#allocation20_spill]] %s1193_s10  ;;  %p1200_p0 = pnand %p774_p13, %p1164_p3 }
  0x20   : > { %s1204_s24 = sadd.s32 %s717_s13, %s716_s12  ;;  %s218_s28 = sand.u32 1, %s1074_s22  }
  0x21   : > { %s718_s6 = sshll.u32 %s1204_s24, 6  ;;  %s1404_s1 = sld [smem:[#allocation21_spill]] }
  0x22   : > { %s222_s25 = scalar_lea.vmem [#allocation5], %s715_s11  ;;  %p727_p1 = scmp.ge.s32.totalorder %s1074_s22, 1 }
  0x23   : > { %s232_s20 = sshll.u32 %s222_s25, 4  ;;  %s1214_s29 = scalar_lea.sflag [#allocation6], %s218_s28  ;;  %s233_s20 = int_to_ptr.vmem [resolvable:$true] %s232_s20 }
  0x24   : > { %p862_p2 = pneg %p1200_p0  ;;  %s873_s21 = scalar_lea.vmem %s233_s20, 128 }
  0x25   : > { %p874_p3 = scmp.ne.s32.totalorder %s233_s20, %s873_s21  ;;  %s1076_s12 = smov [#allocation5]  }
  0x26   : > { %s878_s13 = sshll.u32 %s1076_s12, 4  ;;  %s879_s13 = int_to_ptr.vmem [resolvable:$false] %s878_s13 }
  0x27   : > { %s230_s27 = scalar_lea.hbm %s1404_s1, %s718_s6  ;;  %p876_p4 = pnand %p874_p3, %p862_p2 }
  0x28   : > { %s880_s26 = scalar_lea.vmem %s879_s13, 256  ;;  %p881_p6 = scmp.lt.s32.totalorder %s233_s20, %s879_s13 }
  0x29   : > { %p877_p5 = pneg %p876_p4  ;;  %p882_p7 = scmp.lt.s32.totalorder %s880_s26, %s873_s21 }
  0x2b   : > { %p883_p10 = por %p882_p7, %p881_p6 }
  0x2d   : > { %p884_p11 = pnand %p883_p10, %p877_p5 }
  0x2f   : > { %887 = shalt.err (!%p884_p11)
}
  0x30   : > { %763 = dma.hbm_to_vmem [thread:$0]  (!%p1200_p0), %s230_s27, 128, %s233_s20, %s1214_s29  }
  0x31   : > { %p258_p13 = scmp.lt.s32.totalorder %s1074_s22, 5  ;;  %s209_s7 = scalar_lea.hbm %s1382_s0, %s718_s6 }
  0x32   : > { %s201_s12 = scalar_lea.vmem [#allocation2], %s715_s11  ;;  %s723_s26 = sshll.u32 %s1190_s9, 1 }
  0x33   : > { %p1227_p3 = pnand %p727_p1, %p258_p13  ;;  %s211_s13 = sshll.u32 %s201_s12, 4  ;;  %s212_s13 = int_to_ptr.vmem [resolvable:$true] %s211_s13 }
  0x34   : > { %s198_s1 = scalar_lea.sflag [#allocation3], %s1190_s9  ;;  %s901_s10 = scalar_lea.vmem %s212_s13, 128 }
  0x35   : > { %p902_p4 = scmp.ne.s32.totalorder %s212_s13, %s901_s10  ;;  %s1077_s20 = smov [#allocation2]  }
  0x36   : > { %s906_s27 = sshll.u32 %s1077_s20, 4  ;;  %s907_s27 = int_to_ptr.vmem [resolvable:$false] %s906_s27 }
  0x37   : > { %p904_p5 = pnand %p902_p4, %p862_p2  ;;  %s908_s17 = scalar_lea.vmem %s907_s27, 256 }
  0x38   : > { %p909_p1 = scmp.lt.s32.totalorder %s212_s13, %s907_s27  ;;  %p910_p7 = scmp.lt.s32.totalorder %s908_s17, %s901_s10 }
  0x39   : > { %p905_p6 = pneg %p904_p5 }
  0x3a   : > { %p911_p10 = por %p910_p7, %p909_p1 }
  0x3c   : > { %p912_p11 = pnand %p911_p10, %p905_p6 }
  0x3e   : > { %915 = shalt.err (!%p912_p11)
}
  0x3f   : > { %760 = dma.hbm_to_vmem [thread:$0]  (!%p1200_p0), %s209_s7, 128, %s212_s13, %s198_s1  }
  0x40   : > { %s726_s9 = sshll.u32 %s1204_s24, 4  ;;  %s243_s28 = scalar_lea.vmem [#allocation7], %s723_s26 }
  0x41   : > { %s251_s21 = scalar_lea.hbm %s1384_s2, %s726_s9  ;;  %s253_s12 = sshll.u32 %s243_s28, 4  ;;  %s254_s12 = int_to_ptr.vmem [resolvable:$true] %s253_s12 }
  0x42   : > { %s929_s20 = scalar_lea.vmem %s254_s12, 32  ;;  %s1078_s17 = smov [#allocation7]  }
  0x43   : > { %p930_p13 = scmp.ne.s32.totalorder %s254_s12, %s929_s20  ;;  %s934_s10 = sshll.u32 %s1078_s17, 4  ;;  %s935_s10 = int_to_ptr.vmem [resolvable:$false] %s934_s10 }
  0x44   : > { %s936_s27 = scalar_lea.vmem %s935_s10, 64  ;;  %p937_p6 = scmp.lt.s32.totalorder %s254_s12, %s935_s10 }
  0x45   : > { %p932_p4 = pnand %p930_p13, %p862_p2  ;;  %p938_p1 = scmp.lt.s32.totalorder %s936_s27, %s929_s20 }
  0x47   : > { %p933_p5 = pneg %p932_p4  ;;  %p939_p7 = por %p938_p1, %p937_p6 }
  0x49   : > { %p940_p10 = pnand %p939_p7, %p933_p5 }
  0x4b   : > { %943 = shalt.err (!%p940_p10)
}
  0x4c   : > { %766 = dma.hbm_to_vmem [thread:$0]  (!%p1200_p0), %s251_s21, 32, %s254_s12, %s1214_s29  }
  0x4d   : > { %262 = sbr.rel (%p1227_p3) target bundleno = 410 (0x19a), region = 32  ;;  %s1256_s1 = sand.u32 (!%p1227_p3), 1, %s1050_s16  }
  0x4e   : > { %s1259_s24 = sshll.u32 (!%p1227_p3), %s1256_s1, 3  ;;  %s265_s7 = scalar_lea.sflag (!%p1227_p3), [#allocation3], %s1256_s1 }
  0x4f   : > { %s268_s13 = scalar_lea.vmem (!%p1227_p3), [#allocation2], %s1259_s24 }
  0x52   : > { %1029 = dma.done.wait (%p1174_p8), %s265_s7, 128  }
  0x53   : > { %1031 = vsyncadd (%p1174_p8), %s265_s7, 4294967168  ;;  %s273_s14 = sand.u32 1, %s1150_s23   ;;  %s277_s25 = scalar_lea.vmem [#allocation5], %s1259_s24 }
  0x54   : > { %s274_s29 = scalar_lea.sflag [#allocation6], %s273_s14 }
  0x55   : > { %1033 = dma.done.wait (%p1174_p8), %s274_s29, 160  }
  0x56   : > { %1035 = vsyncadd (%p1174_p8), %s274_s29, 4294967136  ;;  %v330_v0 = vlaneseq  ;;  %s733_s26 = sshll.u32 %s1058_s18, 8  ;;  %v1079_v3 = vmov 1966171168   ;;  %s730_s23 = sshll.u32 %s1256_s1, 1  ;;  %vm1080_vm1 = vmmov 1  }
  0x57   : > { %v334_v1 = vstv %s733_s26  ;;  %v347_v4 = vunpack.c.l.s4 %v1079_v3  ;;  %v1081_v10 = vmov 0   ;;  %v380_v12 = vld [vmem:[%s277_s25] sm:$0xff]  ;;  %s286_s30 = scalar_lea.vmem [#allocation7], %s730_s23  ;;  %v362_v30 = vld [vmem:[%s268_s13] sm:$0xff]  ;;  %vm395_vm10 = vcmask 1043456   ;;  %s731_s9 = sshll.u32 %s1256_s1, 2 }
  0x58   : > { %v331_v2 = vand.u32 127, %v330_v0  ;;  %v1276_v8 = vshrl.u32 %v330_v0, 7  ;;  %v381_v14 = vadd.f32 1e-10, %v380_v12  ;;  %v339_v17 = vld [vmem:[%s286_s30] sm:$0x3]  ;;  %v375_v33 = vcombine.high %v362_v30, %v362_v30 }
  0x59   : > { %v348_v7 = vunpack.c.0.s8 %v347_v4  ;;  %vm340_vm5 = vcmp.eq.s32.totalorder %v339_v17, 255  ;;  %s738_s11 = sshll.u32 %s1058_s18, 1  ;;  %s739_s6 = sshll.u32 %s1062_s19, 2 }
  0x5a   : > { %v332_v5 = vadd.s32 128, %v331_v2  ;;  %v1274_v6 = vadd.s32 %v334_v1, %v331_v2  ;;  %844 = vlog2.f32 %v381_v14  ;;  %v366_v20 = vsub.s32 0, %v1276_v8  ;;  %s522_s21 = sadd.s32 %s739_s6, %s738_s11  ;;  %s318_s28 = scalar_lea.vmem [#allocation8], %s731_s9 }
  0x5b   : > { %v351_v13 = vsub.s32 %v348_v7, %v1276_v8  ;;  %v370_v21 = vsub.s32 1, %v1276_v8  ;;  %s740_s12 = sshll.u32 %s522_s21, 5  ;;  %s526_s20 = sshll.u32 %s318_s28, 4  ;;  %s527_s20 = int_to_ptr.vmem [resolvable:$true] %s526_s20 }
  0x5c   : > { %v1279_v9 = vadd.s32 %v334_v1, %v332_v5  ;;  %vm337_vm0 = vcmp.lt.s32.totalorder %v1274_v6, 384  ;;  %s524_s27 = scalar_lea.hbm %s1385_s3, %s740_s12  ;;  %s505_s7 = scalar_lea.sflag [#allocation4], %s1256_s1 }
  0x5d   : > { %vm341_vm2 = vmxor %vm337_vm0, %vm1080_vm1  ;;  %s944_s13 = scalar_lea.vmem %s527_s20, 64  ;;  %s1082_s14 = smov [#allocation8]  }
  0x5e   : > { %vm338_vm3 = vcmp.lt.s32.totalorder %v1279_v9, 384  ;;  %v343_v11 = vsel %vm341_vm2, 1, %v1081_v10  ;;  %p945_p8 = scmp.ne.s32.totalorder %s527_s20, %s944_s13  ;;  %s948_s29 = sshll.u32 %s1082_s14, 4  ;;  %s949_s29 = int_to_ptr.vmem [resolvable:$false] %s948_s29 }
  0x5f   : > { %vm342_vm4 = vmxor %vm338_vm3, %vm1080_vm1  ;;  %s950_s25 = scalar_lea.vmem %s949_s29, 128  ;;  %p951_p3 = scmp.lt.s32.totalorder %s527_s20, %s949_s29 }
  0x60   : > { %v344_v15 = vsel %vm342_vm4, 1, %v1081_v10  ;;  %p946_p0 = pnand %p945_p8, %p1178_p9  ;;  %p952_p11 = scmp.lt.s32.totalorder %s950_s25, %s944_s13 }
  0x61   : > { %v345_v16 = vcombine.low %v343_v11, %v344_v15 }
  0x62   : > { %p947_p2 = pneg %p946_p0  ;;  %p953_p13 = por %p952_p11, %p951_p3 }
  0x63   : > { %v352_v18 = vrot.slane %v345_v16, %v351_v13 }
  0x64   : > { %p954_p4 = pnand %p953_p13, %p947_p2 }
  0x65   : > { %v359_v19 = vrot.slane %v352_v18, %v351_v13 }
  0x67   : > { %vm360_vm6 = vcmp.ne.s32.totalorder %v359_v19, 0  ;;  %v845_v25 = vpop.eup %844 }
  0x68   : > { %vm361_vm7 = vmor %vm340_vm5, %vm360_vm6  ;;  %v383_v26 = vmul.f32 0.6931472, %v845_v25 }
  0x69   : > { %v379_v22 = vsel %vm361_vm7, 0, %v339_v17  ;;  %v363_v28 = vsel %vm361_vm7, 1, %v1081_v10 }
  0x6a   : > { %v1290_v23 = vrot.slane %v379_v22, %v366_v20  ;;  %v1292_v24 = vrot.slane %v379_v22, %v370_v21  ;;  %v384_v27 = vsub.f32 1e-10, %v383_v26  ;;  %v367_v29 = vrot.slane %v363_v28, %v366_v20 }
  0x6b   : > { %v371_v31 = vrot.slane %v363_v28, %v370_v21 }
  0x6c   : > { %846 = vlog2.f32 %v384_v27  ;;  %vm372_vm8 = vcmp.eq.s32.totalorder %v367_v29, 1  ;;  %vm464_vm15 = vcmp.eq.s32.totalorder %v1290_v23, %v1276_v8 }
  0x6d   : > { %vm373_vm9 = vcmp.eq.s32.totalorder %v371_v31, 1  ;;  %v377_v35 = vsel %vm372_vm8, 0.0, %v362_v30 }
  0x6e   : > { %v378_v37 = vsel %vm373_vm9, 0.0, %v375_v33 }
  0x79   : > { %v847_v32 = vpop.eup %846 }
  0x7a   : > { %v386_v34 = vmul.f32 0.6931472, %v847_v32 }
  0x7c   : > { %v387_v36 = vsub.f32 0.0, %v386_v34 }
  0x7e   : > { %v389_v38 = vcombine.high %v387_v36, %v387_v36  ;;  %v391_v39 = vadd.f32 %v387_v36, %v377_v35 }
  0x80   : > { %v392_v40 = vadd.f32 %v389_v38, %v378_v37  ;;  %v393_v41 = vmul.f32 2.0, %v391_v39 }
  0x82   : > { %v394_v42 = vmul.f32 2.0, %v392_v40  ;;  %v396_v43 = vsel %vm395_vm10, %v393_v41, -inf }
  0x83   : > { %v397_v44 = vrot.slane %v396_v43, 4 }
  0x84   : > { %v403_v45 = vsel %vm395_vm10, %v394_v42, -inf }
  0x85   : > { %v398_v46 = vmax.f32 %v396_v43, %v397_v44  ;;  %v404_v47 = vrot.slane %v403_v45, 4 }
  0x87   : > { %v399_v48 = vrot.slane %v398_v46, 2  ;;  %v405_v49 = vmax.f32 %v403_v45, %v404_v47 }
  0x89   : > { %v400_v50 = vmax.f32 %v398_v46, %v399_v48  ;;  %v406_v51 = vrot.slane %v405_v49, 2 }
  0x8b   : > { %v401_v52 = vrot.slane %v400_v50, 1  ;;  %v407_v53 = vmax.f32 %v405_v49, %v406_v51 }
  0x8d   : > { %v402_v54 = vmax.f32 %v400_v50, %v401_v52  ;;  %v408_v55 = vrot.slane %v407_v53, 1 }
  0x8f   : > { %v409_v56 = vmax.f32 %v407_v53, %v408_v55  ;;  %v410_v57 = vsub.f32 %v393_v41, %v402_v54 }
  0x91   : > { %v411_v58 = vsub.f32 %v394_v42, %v409_v56  ;;  %v412_v59 = vmul.f32 1.442695, %v410_v57 }
  0x93   : > { %848 = vpow2.f32 %v412_v59  ;;  %v414_v60 = vmul.f32 1.442695, %v411_v58 }
  0x95   : > { %850 = vpow2.f32 %v414_v60 }
  0xa0   : > { %v849_v61 = vpop.eup %848 }
  0xa1   : > { %v416_v62 = vsel %vm395_vm10, %v849_v61, 0.0 }
  0xa2   : > { %v851_v63 = vpop.eup %850  ;;  %v417_v0 = vrot.slane %v416_v62, 4 }
  0xa3   : > { %v423_v1 = vsel %vm395_vm10, %v851_v63, 0.0 }
  0xa4   : > { %v418_v2 = vadd.f32 %v417_v0, %v416_v62  ;;  %v424_v3 = vrot.slane %v423_v1, 4 }
  0xa6   : > { %v419_v4 = vrot.slane %v418_v2, 2  ;;  %v425_v5 = vadd.f32 %v424_v3, %v423_v1 }
  0xa8   : > { %v420_v7 = vadd.f32 %v419_v4, %v418_v2  ;;  %v426_v10 = vrot.slane %v425_v5, 2 }
  0xaa   : > { %v421_v11 = vrot.slane %v420_v7, 1  ;;  %v427_v12 = vadd.f32 %v426_v10, %v425_v5 }
  0xac   : > { %v422_v13 = vadd.f32 %v421_v11, %v420_v7  ;;  %v428_v14 = vrot.slane %v427_v12, 1 }
  0xae   : > { %v429_v15 = vadd.f32 %v428_v14, %v427_v12  ;;  %852 = vrcp.f32 %v422_v13 }
  0xb0   : > { %854 = vrcp.f32 %v429_v15 }
  0xbb   : > { %v853_v16 = vpop.eup %852 }
  0xbc   : > { %v431_v17 = vmul.f32 %v853_v16, %v849_v61 }
  0xbd   : > { %v855_v18 = vpop.eup %854 }
  0xbe   : > { %v433_v19 = vmul.f32 %v855_v18, %v851_v63  ;;  %v488_v20 = vsel %vm337_vm0, %v431_v17, 0.0  ;;  %v434_v27 = vmul.f32 2.0, %v431_v17  ;;  %vm465_vm0 = vcmp.eq.s32.totalorder %v1292_v24, %v1276_v8 }
  0xbf   : > { %v490_v21 = vsel %vm395_vm10, %v488_v20, -inf }
  0xc0   : > { %v489_v22 = vsel %vm338_vm3, %v433_v19, 0.0  ;;  %v435_v28 = vmul.f32 2.0, %v433_v19  ;;  %v436_v29 = vmul.f32 %v434_v27, %v431_v17 }
  0xc1   : > { %v491_v25 = vsel %vm395_vm10, %v489_v22, -inf }
  0xc2   : > { %v492_v26 = vmax.f32 %v490_v21, %v491_v25  ;;  %v437_v30 = vmul.f32 %v435_v28, %v433_v19  ;;  %v438_v31 = vadd.f32 1e-06, %v436_v29 }
  0xc4   : > { %493 = vmax.xlane.f32.xlu0 %v492_v26  ;;  %v439_v32 = vadd.f32 1e-06, %v437_v30  ;;  %856 = vrsqrt.f32 %v438_v31  ;;  %vm442_vm11 = vcmp.eq.f32.partialorder %v438_v31, inf  ;;  %v445_v9 = vand.u32 2147483648, %v438_v31 }
  0xc5   : > { %vm444_vm13 = vcmp.eq.f32.partialorder %v438_v31, 0.0 }
  0xc6   : > { %858 = vrsqrt.f32 %v439_v32  ;;  %vm449_vm12 = vcmp.eq.f32.partialorder %v439_v32, inf  ;;  %v452_v36 = vand.u32 2147483648, %v439_v32  ;;  %vm451_vm14 = vcmp.eq.f32.partialorder %v439_v32, 0.0 }
  0xd1   : > { %v857_v33 = vpop.eup %856 }
  0xd2   : > { %v441_v34 = vmul.f32 %v857_v33, %v438_v31 }
  0xd3   : > { %v859_v6 = vpop.eup %858 }
  0xd4   : > { %v448_v35 = vmul.f32 %v859_v6, %v439_v32  ;;  %v443_v37 = vsel %vm442_vm11, %v438_v31, %v441_v34 }
  0xd5   : > { %v446_v39 = vsel %vm444_vm13, %v445_v9, %v443_v37 }
  0xd6   : > { %v450_v38 = vsel %vm449_vm12, %v439_v32, %v448_v35  ;;  %v466_v41 = vsub.f32 0.0, %v446_v39 }
  0xd7   : > { %v453_v40 = vsel %vm451_vm14, %v452_v36, %v450_v38 }
  0xd8   : > { %v467_v42 = vsub.f32 0.0, %v453_v40  ;;  %v468_v43 = vsel %vm464_vm15, %v466_v41, %v446_v39 }
  0xda   : > { %v469_v44 = vsel %vm465_vm0, %v467_v42, %v453_v40 }
  0xdb   : > { %v734_v45 = vpack.c.bf16 %v469_v44, %v468_v43 }
  0xdd   : > { %735 = vst.sshfl [vmem:[%s318_s28] sm:$0x33 pattern:$0x76325410] %v734_v45 }
  0xde   : > { %957 = shalt.err (!%p954_p4)
}
  0xdf   : > { %s958_s26 = scalar_lea.hbm %s524_s27, 64  ;;  %s962_s9 = scalar_lea.hbm %s1385_s3, 256 }
  0xe0   : > { %p959_p5 = scmp.ne.s32.totalorder %s524_s27, %s958_s26  ;;  %p963_p7 = scmp.lt.s32.totalorder %s524_s27, %s1385_s3 }
  0xe1   : > { %p964_p10 = scmp.lt.s32.totalorder %s962_s9, %s958_s26 }
  0xe2   : > { %p960_p6 = pnand %p959_p5, %p1178_p9 }
  0xe3   : > { %p965_p8 = por %p964_p10, %p963_p7 }
  0xe4   : > { %p961_p1 = pneg %p960_p6 }
  0xe6   : > { %p966_p0 = pnand %p965_p8, %p961_p1 }
  0xe8   : > { %969 = shalt.err (!%p966_p0)
}
  0xe9   : > { %753 = dma.vmem_to_hbm [thread:$0]  (%p1178_p9), %s527_s20, 64, %s524_s27, %s505_s7  }
  0xea   : > { %s741_s21 = sshll.u32 %s1062_s19, 1  ;;  %s325_s12 = scalar_lea.vmem [#allocation9], %s1259_s24 }
  0xeb   : > { %s537_s28 = sadd.s32 %s1058_s18, %s741_s21  ;;  %s541_s17 = sshll.u32 %s325_s12, 4  ;;  %s1332_s17 = int_to_ptr.vmem [resolvable:$true] %s541_s17 }
  0xec   : > { %s742_s10 = sshll.u32 %s537_s28, 7  ;;  %s510_s14 = scalar_lea.sflag [#allocation10], %s1256_s1 }
  0xed   : > { %s539_s13 = scalar_lea.hbm %s1386_s4, %s742_s10  ;;  %s970_s29 = scalar_lea.vmem %s1332_s17, 128 }
  0xee   : > { %p971_p2 = scmp.ne.s32.totalorder %s1332_s17, %s970_s29  ;;  %s1083_s18 = smov [#allocation9]  }
  0xef   : > { %s974_s19 = sshll.u32 %s1083_s18, 4  ;;  %s975_s19 = int_to_ptr.vmem [resolvable:$false] %s974_s19 }
  0xf0   : > { %p972_p3 = pnand %p971_p2, %p1178_p9  ;;  %s976_s24 = scalar_lea.vmem %s975_s19, 256 }
  0xf1   : > { %p977_p13 = scmp.lt.s32.totalorder %s1332_s17, %s975_s19  ;;  %p978_p4 = scmp.lt.s32.totalorder %s976_s24, %s970_s29 }
  0xf2   : > { %p973_p11 = pneg %p972_p3 }
  0xf3   : > { %p979_p5 = por %p978_p4, %p977_p13 }
  0xf5   : > { %p980_p6 = pnand %p979_p5, %p973_p11 }
 0x14d   : > { %v494_v8 = vpop.xlane.xlu0 %493 }
 0x14e   : > { %v495_v23 = vrot.slane %v494_v8, 4 }
 0x150   : > { %v496_v24 = vmax.f32 %v494_v8, %v495_v23 }
 0x152   : > { %v497_v46 = vrot.slane %v496_v24, 2 }
 0x154   : > { %v498_v47 = vmax.f32 %v496_v24, %v497_v46 }
 0x156   : > { %v499_v48 = vrot.slane %v498_v47, 1 }
 0x158   : > { %v500_v49 = vmax.f32 %v498_v47, %v499_v48 }
 0x15a   : > { %745 = vpush %v500_v49 }
 0x18b   : > { %s746_s20 = spop %745 }
 0x18c   : > { %v502_v50 = vstv %s746_s20 }
 0x18d   : > { %503 = vst [vmem:[%s325_s12] sm:$0xff] %v502_v50 }
 0x18e   : > { %983 = shalt.err (!%p980_p6)
}
 0x18f   : > { %s984_s25 = scalar_lea.hbm %s539_s13, 128  ;;  %s988_s23 = scalar_lea.hbm %s1386_s4, 512 }
 0x190   : > { %p985_p1 = scmp.ne.s32.totalorder %s539_s13, %s984_s25  ;;  %p989_p8 = scmp.lt.s32.totalorder %s539_s13, %s1386_s4 }
 0x191   : > { %p990_p0 = scmp.lt.s32.totalorder %s988_s23, %s984_s25 }
 0x192   : > { %p986_p7 = pnand %p985_p1, %p1178_p9 }
 0x193   : > { %p991_p2 = por %p990_p0, %p989_p8 }
 0x194   : > { %p987_p10 = pneg %p986_p7 }
 0x196   : > { %p992_p3 = pnand %p991_p2, %p987_p10 }
 0x198   : > { %995 = shalt.err (!%p992_p3)
}
 0x199   : > { %754 = dma.vmem_to_hbm [thread:$0]  (%p1178_p9), %s1332_s17, 128, %s539_s13, %s510_s14  }
 0x19a PF: > { %p775_p11 = scmp.ge.s32.totalorder %s1074_s22, 2  ;;  %s553_s11 = sand.u32 1, %s1046_s15  }
 0x19b   : > { %s554_s6 = scalar_lea.sflag [#allocation4], %s553_s11 }
 0x19c   : > { %p768_p13 = pnand %p775_p11, %p1184_p12 }
 0x19e   : > { %p769_p4 = pneg %p768_p13 }
 0x1a0   : > { %1037 = dma.done.wait (%p769_p4), %s554_s6, 64  }
 0x1a1   : > { %1039 = vsyncadd (%p769_p4), %s554_s6, 4294967232  ;;  %s563_s21 = scalar_lea.sflag [#allocation10], %s553_s11 }
 0x1a2   : > { %1041 = dma.done.wait (%p769_p4), %s563_s21, 128  }
 0x1a3   : > { %1043 = vsyncadd (%p769_p4), %s563_s21, 4294967168  ;;  %s27_s22 = sadd.s32 1, %s1074_s22   ;;  %s1406_s5 = sld [smem:[#allocation15_spill]] }
 0x1a4   : > { %p24_p5 = scmp.ge.s32.totalorder %s27_s22, 6   ;;  %s1407_s17 = sld [smem:[#allocation20_spill]] }
 0x1a5   : > { %s1408_s18 = sld [smem:[#allocation16_spill]]  ;;  %s1412_s15 = smov %s1050_s16 }
 0x1a6   : > { %s1409_s19 = sld [smem:[#allocation17_spill]]  ;;  %26 = sbr.rel (!%p24_p5) target bundleno = 13 (0xd), region = 118 }
 0x1a7   : > { %s1410_s20 = sld [smem:[#allocation18_spill]] }
 0x1a8   : > { %s1411_s21 = sld [smem:[#allocation19_spill]] }
 0x1a9   : > { %s1413_s16 = smov %s1406_s5 }
 0x1ab   :  { %568 = vsyncpa [#allocation3], 1 }
 0x1ac   :  { %570 = vsyncpa [#allocation3 + $0x1], 1 }
 0x1ad   :  { %571 = vsyncpa [#allocation6], 1 }
 0x1ae   :  { %573 = vsyncpa [#allocation6 + $0x1], 1 }
 0x1af   :  { %574 = vsyncpa [#allocation4], 1 }
 0x1b0   :  { %576 = vsyncpa [#allocation4 + $0x1], 1 }
 0x1b1   :  { %577 = vsyncpa [#allocation10], 1 }
 0x1b2   :  { %579 = vsyncpa [#allocation10 + $0x1], 1 }

</bundles_post_ra>
